<compile_context>
chip_gen: v7x
topology: tpu7x:2x2x1
jax: 0.10.0
libtpu: 0.0.40
codegen_flags: <defaults>
</compile_context>

<pallas_src>
import functools

import jax
import jax.numpy as jnp
from jax import lax
from jax.experimental import pallas as pl
from jax.experimental.pallas import tpu as pltpu

_SUBLANE = 8


def _round_up(x, m):
    return (x + m - 1) // m * m


def _tpu_mem_params():
    """(vmem_limit_bytes, tile_budget_reduce, tile_budget_none), per-generation."""
    physical = None
    try:
        physical = getattr(pltpu.get_tpu_info(), "vmem_capacity_bytes", None)
    except Exception:
        physical = None
    if physical is None:
        try:
            kind = jax.devices()[0].device_kind
        except Exception:
            kind = ""
        physical = (64 << 20) if "7" in kind else (128 << 20)
    if physical >= (100 << 20):
        # v5e / v6e: 128 MiB physical -> raise the scoped limit, use big tiles.
        #   reduce path footprint: 2 x 8 MiB          = 16 MiB
        #   'none' path footprint: (2 in + 2 out) x 8 = 32 MiB   (< 64 MiB limit)
        return 64 << 20, 8 << 20, 8 << 20
    # v7x: 64 MiB physical -> keep the 32 MiB default scoped limit.
    #   reduce path footprint: 2 x 8 MiB          = 16 MiB
    #   'none' path footprint: (2 in + 2 out) x 4 = 16 MiB   (< ~24 MiB target)
    return 32 << 20, 8 << 20, 4 << 20


def _num_tensorcores():
    """2 TensorCores per chip only on v7x; 1 on v5e/v6e (conservative elsewhere)."""
    try:
        kind = jax.devices()[0].device_kind
    except Exception:
        return 1
    return 2 if "7" in kind else 1


def _pick_tile_m(n_rows, n_cols, itemsize, byte_budget, requested):
    """Largest sublane-aligned row tile fitting the per-buffer byte budget.
    `requested` (if given) only caps the auto-chosen size."""
    align = _SUBLANE if itemsize >= 4 else 16   # bf16 packs 16 rows per vreg
    row_bytes = max(1, n_cols * itemsize)
    tm = (byte_budget // row_bytes) // align * align
    if requested is not None:
        tm = min(tm, _round_up(requested, align))
    tm = min(tm, _round_up(n_rows, align))
    return max(align, tm)


def _weighted_elementwise_kernel(loss_ref, w_ref, out_ref):
    """'none' path: out = loss * weight (broadcast over rows, loss dtype)."""
    out_ref[...] = loss_ref[...] * w_ref[...]


def _colsum_kernel(loss_ref, partial_ref, *, n_rows, tile_m, tiles_per_core):
    """'sum'/'mean' path: per-core (8, C) f32 column partial sums of `loss`.

    The per-class weight multiply is hoisted to the wrapper (sum_nc loss*w ==
    sum_c w * colsum(loss)); interior tiles skip the row mask entirely.
    """
    core = pl.program_id(0)
    step = pl.program_id(1)

    @pl.when(step == 0)
    def _init():
        partial_ref[...] = jnp.zeros_like(partial_ref)

    tile_idx = core * tiles_per_core + step
    row0 = tile_idx * tile_m
    is_full = row0 + tile_m <= n_rows            # interior tile: no masking needed

    def _accum(vals_f32):
        # vreg-aligned partial sums: summing (tm//8, 8, C) over the leading axis is
        # pure VPU adds into a lane-dense (8, C) accumulator (no per-step XLU
        # reduce, no scalar loop-carried dependency).
        partial_ref[...] += jnp.sum(
            vals_f32.reshape(tile_m // _SUBLANE, _SUBLANE, vals_f32.shape[-1]),
            axis=0)

    @pl.when(is_full)
    def _interior():
        _accum(loss_ref[...].astype(jnp.float32))

    @pl.when(jnp.logical_not(is_full))
    def _edge():
        # Ragged last tile, or a clamped duplicate tile on the second core:
        # mask rows past the true end of the array.
        l = loss_ref[...].astype(jnp.float32)
        rows = row0 + lax.broadcasted_iota(jnp.int32, l.shape, 0)
        _accum(jnp.where(rows < n_rows, l, 0.0))


@functools.partial(jax.jit, static_argnames=("reduction", "tile_m"))
def weighted_loss(loss, weight, *, reduction="mean", tile_m=None):
    """Applies `_WeightedLoss`-style per-class weighting + reduction via Pallas.

    loss:   [N, C] float per-element losses (f32 or bf16; kept in HBM dtype)
    weight: [C]    per-class weights (the registered buffer)
    tile_m: optional cap on the auto-chosen (byte-budget-driven) row tile
    """
    N, C = loss.shape
    itemsize = loss.dtype.itemsize
    vmem_limit, budget_reduce, budget_none = _tpu_mem_params()

    if reduction == "none":
        tm = _pick_tile_m(N, C, itemsize, budget_none, tile_m)
        w2d = weight.astype(loss.dtype).reshape(1, C)   # cast once, outside kernel
        return pl.pallas_call(
            _weighted_elementwise_kernel,
            out_shape=jax.ShapeDtypeStruct((N, C), loss.dtype),
            grid_spec=pltpu.PrefetchScalarGridSpec(
                num_scalar_prefetch=0,
                grid=(pl.cdiv(N, tm),),
                in_specs=[
                    pl.BlockSpec((tm, C), lambda i: (i, 0)),
                    pl.BlockSpec((1, C), lambda i: (0, 0)),
                ],
                out_specs=pl.BlockSpec((tm, C), lambda i: (i, 0)),
            ),
            compiler_params=pltpu.CompilerParams(
                dimension_semantics=("parallel",),
                vmem_limit_bytes=vmem_limit,
            ),
            cost_estimate=pl.CostEstimate(
                flops=N * C,
                transcendentals=0,
                bytes_accessed=2 * N * C * itemsize + C * itemsize,
            ),
        )(loss, w2d)

    if reduction not in ("sum", "mean"):
        raise ValueError(f"unknown reduction: {reduction}")

    tm = _pick_tile_m(N, C, itemsize, budget_reduce, tile_m)
    total_tiles = pl.cdiv(N, tm)
    num_cores = max(1, min(_num_tensorcores(), total_tiles))
    tiles_per_core = pl.cdiv(total_tiles, num_cores)

    kernel = functools.partial(
        _colsum_kernel, n_rows=N, tile_m=tm, tiles_per_core=tiles_per_core)

    def loss_map(core, step):
        t = core * tiles_per_core + step
        return (jnp.minimum(t, total_tiles - 1), 0)   # clamp; OOB tiles are row-masked

    # Shard the row loop across TensorCores only when the chip actually has two.
    core_sem = (getattr(pltpu, "CORE_PARALLEL", "parallel")
                if num_cores > 1 else "arbitrary")

    partials = pl.pallas_call(
        kernel,
        out_shape=jax.ShapeDtypeStruct((num_cores * _SUBLANE, C), jnp.float32),
        grid_spec=pltpu.PrefetchScalarGridSpec(
            num_scalar_prefetch=0,
            grid=(num_cores, tiles_per_core),
            in_specs=[pl.BlockSpec((tm, C), loss_map)],
            # per-core lane-dense accumulator block, resident across the row loop
            out_specs=pl.BlockSpec((_SUBLANE, C), lambda core, step: (core, 0)),
        ),
        compiler_params=pltpu.CompilerParams(
            dimension_semantics=(core_sem, "arbitrary"),
            vmem_limit_bytes=vmem_limit,
        ),
        cost_estimate=pl.CostEstimate(
            flops=N * C,
            transcendentals=0,
            bytes_accessed=N * C * itemsize + num_cores * _SUBLANE * C * 4,
        ),
    )(loss)

    # Tiny final reduce + hoisted per-class weight multiply (sum_c w_c * colsum_c).
    colsum = jnp.sum(partials, axis=0)                         # (C,)
    w_f32 = weight.astype(jnp.float32)
    total = jnp.sum(colsum * w_f32)
    if reduction == "sum":
        return total
    # 'mean': denominator is statically N * sum(weight) (broadcast-weight convention).
    denom = jnp.float32(N) * jnp.sum(w_f32)
    return total / denom


if __name__ == "__main__":
    key = jax.random.PRNGKey(0)
    k_loss, k_w = jax.random.split(key)

    # small shapes: ragged row count (not a multiple of 8) to exercise masking,
    # 128 classes (lane-aligned).
    N, C = 50, 128
    per_elem_loss = jax.random.uniform(k_loss, (N, C), dtype=jnp.float32)
    weight = jax.random.uniform(k_w, (C,), dtype=jnp.float32) + 0.5

    out_mean = weighted_loss(per_elem_loss, weight, reduction="mean")
    out_sum = weighted_loss(per_elem_loss, weight, reduction="sum")
    out_none = weighted_loss(per_elem_loss, weight, reduction="none")
    jax.block_until_ready((out_mean, out_sum, out_none))

    # reference check in plain JAX
    ref_none = per_elem_loss * weight[None, :]
    ref_sum = jnp.sum(ref_none)
    ref_mean = ref_sum / (N * jnp.sum(weight))
    assert jnp.allclose(out_none, ref_none, atol=1e-5)
    assert jnp.allclose(out_sum, ref_sum, rtol=1e-5, atol=1e-3)
    assert jnp.allclose(out_mean, ref_mean, rtol=1e-5, atol=1e-6)

    # multi-tile path (small tile override): interior tiles skip masking,
    # ragged last tile (and any clamped duplicate on a 2nd core) gets masked.
    N2 = 72
    loss2 = jax.random.uniform(k_loss, (N2, C), dtype=jnp.float32)
    out2 = weighted_loss(loss2, weight, reduction="sum", tile_m=16)
    ref2 = jnp.sum(loss2 * weight[None, :])
    jax.block_until_ready(out2)
    assert jnp.allclose(out2, ref2, rtol=1e-5, atol=1e-3)

    # bf16 input + non-multiple-of-128 class count
    N3, C3 = 40, 64
    loss3 = jax.random.uniform(k_loss, (N3, C3), dtype=jnp.float32).astype(jnp.bfloat16)
    w3 = jax.random.uniform(k_w, (C3,), dtype=jnp.float32) + 0.5
    out3 = weighted_loss(loss3, w3, reduction="mean", tile_m=16)
    ref3 = jnp.sum(loss3.astype(jnp.float32) * w3[None, :]) / (N3 * jnp.sum(w3))
    jax.block_until_ready(out3)
    assert jnp.allclose(out3, ref3, rtol=2e-2)

    print("KERNEL_OK")
</pallas_src>

<mosaic_0001>
module attributes {stable_mosaic.version = 11 : i64} {
  func.func @_colsum_kernel(%arg0: i32, %arg1: i32, %arg2: memref<56x128xf32, #tpu.memory_space<vmem>>, %arg3: memref<8x128xf32, #tpu.memory_space<vmem>>) attributes {dimension_semantics = [#tpu.dimension_semantics<arbitrary>, #tpu.dimension_semantics<arbitrary>], iteration_bounds = array<i64: 1, 1>, scalar_prefetch = 0 : i64, scratch_operands = 0 : i64, tpu.core_type = #tpu.core_type<tc>, window_params = [{transform_indices = @transform_0, window_bounds = array<i64: 56, 128>}, {transform_indices = @transform_1, window_bounds = array<i64: 8, 128>}]} {
    %c0_i32 = arith.constant 0 : i32
    %0 = arith.cmpi eq, %arg1, %c0_i32 : i32
    %1 = arith.extui %0 : i1 to i32
    %c0_i32_0 = arith.constant 0 : i32
    %2 = arith.cmpi ne, %1, %c0_i32_0 : i32
    scf.if %2 {
      %cst = arith.constant 0.000000e+00 : f32
      %13 = vector.broadcast %cst : f32 to vector<8x128xf32>
      %c0 = arith.constant 0 : index
      %c0_4 = arith.constant 0 : index
      %14 = vector.load %arg3[%c0, %c0_4] : memref<8x128xf32, #tpu.memory_space<vmem>>, vector<8x128xf32>
      tpu.vector_store %arg3[%c0, %c0_4], %13 {strides = array<i32>} : memref<8x128xf32, #tpu.memory_space<vmem>>, vector<8x128xf32>,
    } else {
    }
    %c1_i32 = arith.constant 1 : i32
    %3 = arith.muli %arg0, %c1_i32 : i32
    %4 = arith.addi %3, %arg1 : i32
    %c56_i32 = arith.constant 56 : i32
    %5 = arith.muli %4, %c56_i32 : i32
    %c56_i32_1 = arith.constant 56 : i32
    %6 = arith.addi %5, %c56_i32_1 : i32
    %c50_i32 = arith.constant 50 : i32
    %7 = arith.cmpi sle, %6, %c50_i32 : i32
    %8 = arith.extui %7 : i1 to i32
    %c0_i32_2 = arith.constant 0 : i32
    %9 = arith.cmpi ne, %8, %c0_i32_2 : i32
    scf.if %9 {
      %c0 = arith.constant 0 : index
      %c0_4 = arith.constant 0 : index
      %13 = vector.load %arg2[%c0, %c0_4] : memref<56x128xf32, #tpu.memory_space<vmem>>, vector<56x128xf32>
      %c0_5 = arith.constant 0 : index
      %c0_6 = arith.constant 0 : index
      %14 = vector.load %arg3[%c0_5, %c0_6] : memref<8x128xf32, #tpu.memory_space<vmem>>, vector<8x128xf32>
      %15 = vector.shape_cast %13 : vector<56x128xf32> to vector<7x8x128xf32>
      %cst = arith.constant dense<0.000000e+00> : vector<8x128xf32>
      %16 = vector.multi_reduction <add>, %15, %cst [0] : vector<7x8x128xf32> to vector<8x128xf32>
      %17 = arith.addf %14, %16 : vector<8x128xf32>
      %c0_7 = arith.constant 0 : index
      %c0_8 = arith.constant 0 : index
      %18 = vector.load %arg3[%c0_7, %c0_8] : memref<8x128xf32, #tpu.memory_space<vmem>>, vector<8x128xf32>
      tpu.vector_store %arg3[%c0_7, %c0_8], %17 {strides = array<i32>} : memref<8x128xf32, #tpu.memory_space<vmem>>, vector<8x128xf32>,
    } else {
    }
    %true = arith.constant true
    %10 = arith.xori %7, %true : i1
    %11 = arith.extui %10 : i1 to i32
    %c0_i32_3 = arith.constant 0 : i32
    %12 = arith.cmpi ne, %11, %c0_i32_3 : i32
    scf.if %12 {
      %c0 = arith.constant 0 : index
      %c0_4 = arith.constant 0 : index
      %13 = vector.load %arg2[%c0, %c0_4] : memref<56x128xf32, #tpu.memory_space<vmem>>, vector<56x128xf32>
      %14 = tpu.iota {dimensions = array<i32: 0>} : vector<56x128xi32>
      %15 = vector.broadcast %5 : i32 to vector<56x128xi32>
      %16 = arith.addi %15, %14 : vector<56x128xi32>
      %c50_i32_5 = arith.constant 50 : i32
      %17 = vector.broadcast %c50_i32_5 : i32 to vector<56x128xi32>
      %18 = arith.cmpi slt, %16, %17 : vector<56x128xi32>
      %cst = arith.constant 0.000000e+00 : f32
      %19 = vector.broadcast %cst : f32 to vector<56x128xf32>
      %20 = arith.select %18, %13, %19 : vector<56x128xi1>, vector<56x128xf32>
      %c0_6 = arith.constant 0 : index
      %c0_7 = arith.constant 0 : index
      %21 = vector.load %arg3[%c0_6, %c0_7] : memref<8x128xf32, #tpu.memory_space<vmem>>, vector<8x128xf32>
      %22 = vector.shape_cast %20 : vector<56x128xf32> to vector<7x8x128xf32>
      %cst_8 = arith.constant dense<0.000000e+00> : vector<8x128xf32>
      %23 = vector.multi_reduction <add>, %22, %cst_8 [0] : vector<7x8x128xf32> to vector<8x128xf32>
      %24 = arith.addf %21, %23 : vector<8x128xf32>
      %c0_9 = arith.constant 0 : index
      %c0_10 = arith.constant 0 : index
      %25 = vector.load %arg3[%c0_9, %c0_10] : memref<8x128xf32, #tpu.memory_space<vmem>>, vector<8x128xf32>
      tpu.vector_store %arg3[%c0_9, %c0_10], %24 {strides = array<i32>} : memref<8x128xf32, #tpu.memory_space<vmem>>, vector<8x128xf32>,
    } else {
    }
    return
  }
  func.func @transform_0(%arg0: i32, %arg1: i32) -> (i32, i32) {
    %c1_i32 = arith.constant 1 : i32
    %0 = arith.muli %arg0, %c1_i32 : i32
    %1 = arith.addi %0, %arg1 : i32
    %c0_i32 = arith.constant 0 : i32
    %2 = arith.minsi %1, %c0_i32 : i32
    %c0_i32_0 = arith.constant 0 : i32
    %c0_i32_1 = arith.constant 0 : i32
    return %2, %c0_i32_0 : i32, i32
  }
  func.func @transform_1(%arg0: i32, %arg1: i32) -> (i32, i32) {
    %c0_i32 = arith.constant 0 : i32
    %c0_i32_0 = arith.constant 0 : i32
    return %arg0, %c0_i32 : i32, i32
  }
}

</mosaic_0001>

<bundles_post_ra>
// kernel: weighted_loss.1
= control target key start
LH: loop header
LB: loop body
LE: loop exit
PB: predicated region body
PF: predicated region fallthrough
CT: control target
= control target key end

     0   :  { %6 = vsyncpa [#allocation3], 0  ;;  %s219_s0 = inlined_call_operand.hbm [shape: f32[50,128], index: 0, kind: input, shape index: {}]   ;;  %s220_s1 = inlined_call_operand.hbm [shape: f32[8,128], index: 1, kind: output, shape index: {}]  }
   0x1   :  { %7 = vsyncpa [#allocation4], 0  ;;  %s181_s6 = smov [#allocation2]   ;;  %s133_s10 = scalar_lea.hbm %s219_s0, 896 }
   0x2   :  { %s19_s7 = sshll.u32 %s181_s6, 4  ;;  %p134_p0 = scmp.ne.s32.totalorder %s219_s0, %s133_s10  ;;  %s20_s7 = int_to_ptr.vmem [resolvable:$true] %s19_s7 }
   0x3   :  { %p137_p1 = scmp.lt.u32.totalorder %s133_s10, %s219_s0 }
   0x5   :  { %p139_p2 = pnand %p137_p1, %p134_p0 }
   0x7   :  { %142 = shalt.err (!%p139_p2)
}
   0x8   :  { %s143_s15 = scalar_lea.vmem %s20_s7, 896  ;;  %p148_p4 = scmp.lt.s32.totalorder %s20_s7, %s20_s7 }
   0x9   :  { %p144_p3 = scmp.ne.s32.totalorder %s20_s7, %s143_s15  ;;  %p149_p5 = scmp.lt.s32.totalorder %s143_s15, %s143_s15 }
   0xb   :  { %p150_p6 = por %p149_p5, %p148_p4 }
   0xd   :  { %p151_p7 = pnand %p150_p6, %p144_p3 }
   0xf   :  { %154 = shalt.err (!%p151_p7)
}
  0x10   :  { %s182_s16 = smov 128   ;;  %s183_s17 = smov 8  }
  0x11   :  { %25 = dma.hbm_to_vmem [thread:$0]  %s219_s0, 896, %s20_s7, [#allocation3], %s182_s16, %s182_s16, %s183_s17  }
  0x12   :  { %177 = dma.done.wait [#allocation3], 896  }
  0x13   :  { %178 = vsyncadd [#allocation3], 4294966400  ;;  %v72_v0 = vlaneseq  ;;  %v65_v2 = vld [vmem:[#allocation2] sm:$0xff]  ;;  %v66_v3 = vld [vmem:[#allocation2 + $0x8] sm:$0xff]  ;;  %s184_s0 = smov [#allocation5]  }
  0x14   :  { %v67_v4 = vld [vmem:[#allocation2 + $0x10] sm:$0xff]  ;;  %v103_v6 = vadd.f32 %v66_v3, %v65_v2  ;;  %v68_v7 = vld [vmem:[#allocation2 + $0x18] sm:$0xff]  ;;  %v69_v9 = vld [vmem:[#allocation2 + $0x20] sm:$0xff]  ;;  %s117_s20 = sshll.u32 %s184_s0, 4  ;;  %s118_s20 = int_to_ptr.vmem [resolvable:$true] %s117_s20 }
  0x15   :  { %v73_v1 = vshrl.u32 %v72_v0, 7  ;;  %v71_v10 = vld [vmem:[#allocation2 + $0x30] sm:$0xff]  ;;  %v70_v12 = vld [vmem:[#allocation2 + $0x28] sm:$0xff]  ;;  %s155_s21 = scalar_lea.vmem %s118_s20, 128  ;;  %p160_p9 = scmp.lt.s32.totalorder %s118_s20, %s118_s20 }
  0x16   :  { %v104_v8 = vadd.f32 %v103_v6, %v67_v4  ;;  %p156_p8 = scmp.ne.s32.totalorder %s118_s20, %s155_s21  ;;  %p161_p10 = scmp.lt.s32.totalorder %s155_s21, %s155_s21 }
  0x17   :  { %v79_v5 = vadd.s32 48, %v73_v1 }
  0x18   :  { %v105_v11 = vadd.f32 %v104_v8, %v68_v7  ;;  %p162_p11 = por %p161_p10, %p160_p9 }
  0x19   :  { %vm94_vm0 = vcmp.lt.s32.totalorder %v79_v5, 50 }
  0x1a   :  { %v106_v13 = vadd.f32 %v105_v11, %v69_v9  ;;  %v101_v14 = vsel %vm94_vm0, %v71_v10, 0.0  ;;  %p163_p12 = pnand %p162_p11, %p156_p8 }
  0x1c   :  { %v107_v15 = vadd.f32 %v106_v13, %v70_v12 }
  0x1e   :  { %v108_v16 = vadd.f32 %v107_v15, %v101_v14 }
  0x20   :  { %110 = vst [vmem:[#allocation5] sm:$0xff] %v108_v16 }
  0x21   :  { %166 = shalt.err (!%p163_p12)
}
  0x22   :  { %s167_s24 = scalar_lea.hbm %s220_s1, 128 }
  0x23   :  { %p168_p13 = scmp.ne.s32.totalorder %s220_s1, %s167_s24  ;;  %p171_p0 = scmp.lt.u32.totalorder %s167_s24, %s220_s1 }
  0x25   :  { %p173_p1 = pnand %p171_p0, %p168_p13 }
  0x27   :  { %176 = shalt.err (!%p173_p1)
}
  0x28   :  { %120 = dma.vmem_to_hbm [thread:$0]  %s118_s20, 128, %s220_s1, [#allocation4]  }
  0x29   :  { %179 = dma.done.wait [#allocation4], 128  }
  0x2a   :  { %180 = vsyncadd [#allocation4], 4294967168 }
  0x2b   :  { %124 = vsyncpa [#allocation3], 1 }
  0x2c   :  { %125 = vsyncpa [#allocation4], 1 }

</bundles_post_ra>
